<compile_context>
chip_gen: v7x
topology: tpu7x:2x2x1
jax: 0.10.0
libtpu: 0.0.40
codegen_flags: <defaults>
</compile_context>

<pallas_src>
import jax
import jax.numpy as jnp
from jax.experimental import pallas as pl
from jax.experimental.pallas import tpu as pltpu

LANES = 1024  # 8 vregs wide: lane-dense, unmasked stores


def _gmof_kernel(rho_sq_ref, x_ref, o_ref):
    rho_sq = rho_sq_ref[0]                      # f32 scalar from SMEM
    x = x_ref[...].astype(jnp.float32)          # compute in f32 regardless of input dtype
    sq = x * x
    dist = sq / (sq + rho_sq)
    o_ref[...] = (rho_sq * dist).astype(o_ref.dtype)


def _device_tuning():
    """Returns (block_bytes, vmem_limit_bytes, use_core_parallel) per chip gen."""
    kind = ""
    try:
        kind = jax.devices()[0].device_kind.lower()
    except Exception:
        pass
    if "v7" in kind:          # 2 TCs/chip, 64 MiB VMEM/TC, ~3.2 TB/s
        return 8 << 20, 48 << 20, True
    if "v6" in kind:          # 1 TC, 128 MiB VMEM, ~1.4 TB/s
        return 4 << 20, 32 << 20, False
    return 2 << 20, 32 << 20, False   # v5e and older / unknown: stay conservative


def _gmof_aligned(x2d, rho_sq_vec):
    """Run the Pallas kernel on a (rows, LANES) lane-aligned slab."""
    rows = x2d.shape[0]
    dtype = x2d.dtype
    itemsize = jnp.dtype(dtype).itemsize
    block_bytes, vmem_limit, use_core_parallel = _device_tuning()

    # Keep block bytes constant across dtypes; rows stay (8,128)-friendly.
    tile_rows = max(8, block_bytes // (LANES * itemsize))
    tile_rows = min(tile_rows, rows)
    grid = (pl.cdiv(rows, tile_rows),)     # ragged last block handled by Pallas

    total = rows * LANES
    cost = pl.CostEstimate(
        flops=4 * total,
        transcendentals=0,
        bytes_accessed=2 * total * itemsize,
    )

    def run(dim_sem):
        return pl.pallas_call(
            _gmof_kernel,
            out_shape=jax.ShapeDtypeStruct((rows, LANES), dtype),
            grid_spec=pltpu.PrefetchScalarGridSpec(
                num_scalar_prefetch=1,      # rho_sq lives in SMEM
                grid=grid,
                in_specs=[pl.BlockSpec((tile_rows, LANES), lambda i, rho: (i, 0))],
                out_specs=pl.BlockSpec((tile_rows, LANES), lambda i, rho: (i, 0)),
            ),
            compiler_params=pltpu.CompilerParams(
                dimension_semantics=dim_sem,
                vmem_limit_bytes=vmem_limit,
            ),
            cost_estimate=cost,
        )(rho_sq_vec, x2d)

    if use_core_parallel:
        # v7x: split the mem-bound stream across both TensorCores.
        try:
            return run((pltpu.CORE_PARALLEL,))
        except Exception:
            pass  # fall back to the portable path below
    return run(("parallel",))


def gmof(residual, rho=1.0):
    """Pallas TPU implementation of GMoF.forward."""
    orig_shape = residual.shape
    dtype = residual.dtype

    # rho**2 built with jnp ops: works for Python floats and traced/learned rho.
    rho_sq = jnp.square(jnp.asarray(rho, dtype=jnp.float32))
    rho_sq_vec = rho_sq.reshape(1)

    flat = residual.reshape(-1)
    n = flat.shape[0]
    n_main = n - (n % LANES)    # lane-aligned prefix handled by the kernel

    def _tail_jnp(t):
        sq = t.astype(jnp.float32) ** 2
        return (rho_sq * (sq / (sq + rho_sq))).astype(dtype)

    if n_main == 0:
        # Fewer than 1024 elements: per-grid-step overhead dominates, plain jnp wins.
        return _tail_jnp(flat).reshape(orig_shape)

    out_main = _gmof_aligned(flat[:n_main].reshape(n_main // LANES, LANES), rho_sq_vec)

    if n_main == n:
        # Aligned path (typical NCHW sizes): no padding, no slicing, no extra passes.
        return out_main.reshape(orig_shape)

    # <=1023 trailing elements computed with plain jnp; no pad / output-slice passes.
    out_tail = _tail_jnp(flat[n_main:])
    return jnp.concatenate([out_main.reshape(-1), out_tail]).reshape(orig_shape)


def gmof_ref(residual, rho=1.0):
    """Plain JAX reference (mirrors the PyTorch module)."""
    sq = residual.astype(jnp.float32) ** 2
    dist = sq / (sq + rho ** 2)
    return ((rho ** 2) * dist).astype(residual.dtype)


if __name__ == "__main__":
    key = jax.random.PRNGKey(0)
    k1, k2 = jax.random.split(key)

    rho = 1.0

    # Small NCHW-like residual (aligned path: 2048 elements, no tail).
    x = jax.random.normal(k1, (2, 4, 16, 16), dtype=jnp.float32)
    out = jax.block_until_ready(gmof(x, rho=rho))
    assert out.shape == x.shape and out.dtype == x.dtype
    assert jnp.allclose(out, gmof_ref(x, rho=rho), atol=1e-6, rtol=1e-6)

    # Non-aligned shape: exercises the aligned-prefix kernel + jnp-tail path.
    y = jax.random.normal(k2, (3, 5, 7, 11), dtype=jnp.float32)
    out_y = jax.block_until_ready(gmof(y, rho=rho))
    assert out_y.shape == y.shape and out_y.dtype == y.dtype
    assert jnp.allclose(out_y, gmof_ref(y, rho=rho), atol=1e-6, rtol=1e-6)

    print("KERNEL_OK")
</pallas_src>

<mosaic_0001>
module attributes {stable_mosaic.version = 11 : i64} {
  func.func @_gmof_kernel(%arg0: i32, %arg1: memref<1xf32, #tpu.memory_space<smem>>, %arg2: memref<2x1024xf32, #tpu.memory_space<vmem>>, %arg3: memref<2x1024xf32, #tpu.memory_space<vmem>>) attributes {dimension_semantics = [#tpu.dimension_semantics<parallel>], iteration_bounds = array<i64: 1>, scalar_prefetch = 1 : i64, scratch_operands = 0 : i64, tpu.core_type = #tpu.core_type<tc>, window_params = [{transform_indices = @transform_0, window_bounds = array<i64: 2, 1024>}, {transform_indices = @transform_1, window_bounds = array<i64: 2, 1024>}]} {
    %c0 = arith.constant 0 : index
    %0 = memref.load %arg1[%c0] : memref<1xf32, #tpu.memory_space<smem>>
    %c0_0 = arith.constant 0 : index
    %c0_1 = arith.constant 0 : index
    %1 = vector.load %arg2[%c0_0, %c0_1] : memref<2x1024xf32, #tpu.memory_space<vmem>>, vector<2x1024xf32>
    %2 = arith.mulf %1, %1 : vector<2x1024xf32>
    %3 = vector.broadcast %0 : f32 to vector<2x1024xf32>
    %4 = arith.addf %2, %3 : vector<2x1024xf32>
    %5 = arith.divf %2, %4 : vector<2x1024xf32>
    %6 = vector.broadcast %0 : f32 to vector<2x1024xf32>
    %7 = arith.mulf %6, %5 : vector<2x1024xf32>
    %c0_2 = arith.constant 0 : index
    %c0_3 = arith.constant 0 : index
    %8 = vector.load %arg3[%c0_2, %c0_3] : memref<2x1024xf32, #tpu.memory_space<vmem>>, vector<2x1024xf32>
    tpu.vector_store %arg3[%c0_2, %c0_3], %7 {strides = array<i32>} : memref<2x1024xf32, #tpu.memory_space<vmem>>, vector<2x1024xf32>,
    return
  }
  func.func @transform_0(%arg0: i32, %arg1: memref<1xf32, #tpu.memory_space<smem>>) -> (i32, i32) {
    %c0_i32 = arith.constant 0 : i32
    %c0_i32_0 = arith.constant 0 : i32
    return %arg0, %c0_i32 : i32, i32
  }
  func.func @transform_1(%arg0: i32, %arg1: memref<1xf32, #tpu.memory_space<smem>>) -> (i32, i32) {
    %c0_i32 = arith.constant 0 : i32
    %c0_i32_0 = arith.constant 0 : i32
    return %arg0, %c0_i32 : i32, i32
  }
}

</mosaic_0001>

<bundles_post_ra>
// kernel: tpu_custom_call.1
= control target key start
LH: loop header
LB: loop body
LE: loop exit
PB: predicated region body
PF: predicated region fallthrough
CT: control target
= control target key end

     0   :  { %8 = vsyncpa [#allocation5], 0  ;;  %s152_s0 = inlined_call_operand.<no memory space> [shape: f32[1], index: 0, kind: input, shape index: {}]   ;;  %s153_s1 = inlined_call_operand.hbm [shape: f32[2,1024], index: 1, kind: input, shape index: {}]   ;;  %s154_s2 = inlined_call_operand.hbm [shape: f32[2,1024], index: 2, kind: output, shape index: {}]  }
   0x1   :  { %9 = vsyncpa [#allocation6], 0  ;;  %s108_s9 = smov [#allocation4]   ;;  %s60_s13 = scalar_lea.hbm %s153_s1, 256 }
   0x2   :  { %s16_s10 = sshll.u32 %s108_s9, 4  ;;  %p61_p0 = scmp.ne.s32.totalorder %s153_s1, %s60_s13  ;;  %s17_s10 = int_to_ptr.vmem [resolvable:$true] %s16_s10 }
   0x3   :  { %p64_p1 = scmp.lt.u32.totalorder %s60_s13, %s153_s1 }
   0x5   :  { %p66_p2 = pnand %p64_p1, %p61_p0 }
   0x7   :  { %69 = shalt.err (!%p66_p2)
}
   0x8   :  { %s70_s18 = scalar_lea.vmem %s17_s10, 256  ;;  %p75_p4 = scmp.lt.s32.totalorder %s17_s10, %s17_s10 }
   0x9   :  { %p71_p3 = scmp.ne.s32.totalorder %s17_s10, %s70_s18  ;;  %p76_p5 = scmp.lt.s32.totalorder %s70_s18, %s70_s18 }
   0xb   :  { %p77_p6 = por %p76_p5, %p75_p4 }
   0xd   :  { %p78_p7 = pnand %p77_p6, %p71_p3 }
   0xf   :  { %81 = shalt.err (!%p78_p7)
}
  0x10   :  { %19 = dma.hbm_to_vmem [thread:$0]  %s153_s1, 256, %s17_s10, [#allocation5]  }
  0x11   :  { %104 = dma.done.wait [#allocation5], 256  }
  0x12   :  { %105 = vsyncadd [#allocation5], 4294967040  ;;  %v24_v0 = vld [vmem:[#allocation4] sm:$0xff]  ;;  %v28_v1 = vstv %s152_s0  ;;  %v25_v2 = vld [vmem:[#allocation4 + $0x8] sm:$0xff]  ;;  %s109_s23 = smov [#allocation7]  }
  0x13   :  { %v26_v3 = vmul.f32 %v24_v0, %v24_v0  ;;  %v27_v4 = vmul.f32 %v25_v2, %v25_v2  ;;  %s45_s24 = sshll.u32 %s109_s23, 4  ;;  %s46_s24 = int_to_ptr.vmem [resolvable:$true] %s45_s24 }
  0x14   :  { %s82_s1 = scalar_lea.vmem %s46_s24, 256  ;;  %p87_p9 = scmp.lt.s32.totalorder %s46_s24, %s46_s24 }
  0x15   :  { %v29_v5 = vadd.f32 %v28_v1, %v26_v3  ;;  %v30_v6 = vadd.f32 %v28_v1, %v27_v4  ;;  %p83_p8 = scmp.ne.s32.totalorder %s46_s24, %s82_s1  ;;  %p88_p10 = scmp.lt.s32.totalorder %s82_s1, %s82_s1 }
  0x17   :  { %56 = vrcp.f32 %v29_v5  ;;  %p89_p11 = por %p88_p10, %p87_p9 }
  0x18   :  { %58 = vrcp.f32 %v30_v6 }
  0x19   :  { %p90_p12 = pnand %p89_p11, %p83_p8 }
  0x21   :  { %v57_v7 = vpop.eup %56 }
  0x22   :  { %v59_v8 = vpop.eup %58  ;;  %v32_v9 = vmul.f32 %v57_v7, %v26_v3 }
  0x23   :  { %v34_v10 = vmul.f32 %v59_v8, %v27_v4 }
  0x24   :  { %v35_v11 = vmul.f32 %v32_v9, %v28_v1 }
  0x25   :  { %v36_v12 = vmul.f32 %v34_v10, %v28_v1 }
  0x26   :  { %37 = vst [vmem:[#allocation7] sm:$0xff] %v35_v11 }
  0x27   :  { %38 = vst [vmem:[#allocation7 + $0x8] sm:$0xff] %v36_v12 }
  0x28   :  { %93 = shalt.err (!%p90_p12)
}
  0x29   :  { %s94_s26 = scalar_lea.hbm %s154_s2, 256 }
  0x2a   :  { %p95_p13 = scmp.ne.s32.totalorder %s154_s2, %s94_s26  ;;  %p98_p0 = scmp.lt.u32.totalorder %s94_s26, %s154_s2 }
  0x2c   :  { %p100_p1 = pnand %p98_p0, %p95_p13 }
  0x2e   :  { %103 = shalt.err (!%p100_p1)
}
  0x2f   :  { %48 = dma.vmem_to_hbm [thread:$0]  %s46_s24, 256, %s154_s2, [#allocation6]  }
  0x30   :  { %106 = dma.done.wait [#allocation6], 256  }
  0x31   :  { %107 = vsyncadd [#allocation6], 4294967040 }
  0x32   :  { %52 = vsyncpa [#allocation5], 1 }
  0x33   :  { %53 = vsyncpa [#allocation6], 1 }

</bundles_post_ra>
